<compile_context>
chip_gen: v7x
topology: tpu7x:2x2x1
jax: 0.10.0
libtpu: 0.0.40
codegen_flags: <defaults>
</compile_context>

<pallas_src>
import jax
import jax.numpy as jnp
from jax.experimental import pallas as pl
from jax.experimental.pallas import tpu as pltpu

LATENT_DIMS = 3
HIDDEN = 512
OUT_FEATURES = 5
PADDED_OUT = 128  # lane-dense output width (multiple of 128)


def decoder_kernel(z_ref, w1_ref, b1_ref, w2_ref, b2_ref, o_ref):
    z = z_ref[...]            # (B, 3)
    w1 = w1_ref[...]          # (3, 512)

    # Layer 1 on the VPU: fold the bias in as the starting term, then three
    # broadcasted multiply-adds over a (B, 512) tile.
    h = b1_ref[...] + z[:, 0:1] * w1[0:1, :]
    h = h + z[:, 1:2] * w1[1:2, :]
    h = h + z[:, 2:3] * w1[2:3, :]
    h = jnp.maximum(h, 0.0)   # relu, f32 on the VPU

    # Layer 2 on the MXU with a lane-dense (padded-to-128) output block.
    y = jnp.dot(h, w2_ref[...], preferred_element_type=jnp.float32)
    y = y + b2_ref[...]       # (B, 128) + (1, 128) broadcast
    o_ref[...] = jax.nn.sigmoid(y)


def decoder_forward(z, w1, b1, w2, b2):
    """z: (B, 3); w1: (3, 512); b1: (1, 512); w2: (512, 5); b2: (1, 5)."""
    B = z.shape[0]

    # Zero-pad the second-layer weights/bias to a lane-dense 128-wide output.
    # Padded columns are zero, so padded lanes hold sigmoid(0)=0.5 garbage that
    # is sliced away below and never read.
    w2p = jnp.zeros((HIDDEN, PADDED_OUT), jnp.float32).at[:, :OUT_FEATURES].set(w2)
    b2p = jnp.zeros((1, PADDED_OUT), jnp.float32).at[:, :OUT_FEATURES].set(b2)

    cost = pl.CostEstimate(
        flops=2 * B * HIDDEN * LATENT_DIMS        # layer-1 FMAs
        + B * HIDDEN                              # relu
        + 2 * B * HIDDEN * PADDED_OUT             # layer-2 matmul
        + B * PADDED_OUT,                         # bias add
        transcendentals=B * PADDED_OUT,           # sigmoid
        bytes_accessed=4 * (B * LATENT_DIMS + LATENT_DIMS * HIDDEN + HIDDEN
                            + HIDDEN * PADDED_OUT + PADDED_OUT
                            + B * PADDED_OUT),
    )

    vmem = pl.BlockSpec(memory_space=pltpu.MemorySpace.VMEM)
    out_padded = pl.pallas_call(
        decoder_kernel,
        out_shape=jax.ShapeDtypeStruct((B, PADDED_OUT), jnp.float32),
        in_specs=[vmem, vmem, vmem, vmem, vmem],
        out_specs=pl.BlockSpec(memory_space=pltpu.MemorySpace.VMEM),
        cost_estimate=cost,
    )(z, w1, b1, w2p, b2p)

    # TODO(synk): the original forward does z.reshape((72, 1, 1, 17, 2)) which
    # needs 2448 elements; a (B, 5) output can never supply that (2448 % 5 != 0),
    # so the reshape always errors in PyTorch and is omitted here.
    return out_padded[:, :OUT_FEATURES]


def init_params(key):
    """Deterministic init mimicking nn.Linear's uniform(-1/sqrt(fan_in), ...)."""
    k1, k2, k3, k4 = jax.random.split(key, 4)
    bound1 = 1.0 / jnp.sqrt(jnp.float32(LATENT_DIMS))
    bound2 = 1.0 / jnp.sqrt(jnp.float32(HIDDEN))
    w1 = jax.random.uniform(k1, (LATENT_DIMS, HIDDEN), jnp.float32,
                            minval=-bound1, maxval=bound1)
    b1 = jax.random.uniform(k2, (1, HIDDEN), jnp.float32,
                            minval=-bound1, maxval=bound1)
    w2 = jax.random.uniform(k3, (HIDDEN, OUT_FEATURES), jnp.float32,
                            minval=-bound2, maxval=bound2)
    b2 = jax.random.uniform(k4, (1, OUT_FEATURES), jnp.float32,
                            minval=-bound2, maxval=bound2)
    return w1, b1, w2, b2


if __name__ == "__main__":
    key = jax.random.PRNGKey(0)
    k_params, k_z = jax.random.split(key)
    w1, b1, w2, b2 = init_params(k_params)

    B = 72  # small batch (matches the leading 72 in the module's reshape hint)
    z = jax.random.normal(k_z, (B, LATENT_DIMS), jnp.float32)

    out = decoder_forward(z, w1, b1, w2, b2)
    out = jax.block_until_ready(out)

    # Reference check in plain JAX (same math, same params).
    ref = jax.nn.sigmoid(jnp.maximum(z @ w1 + b1, 0.0) @ w2 + b2)
    assert out.shape == (B, OUT_FEATURES)
    assert jnp.allclose(out, ref, atol=1e-5, rtol=1e-5)

    print("KERNEL_OK")
</pallas_src>

<mosaic_0001>
module attributes {stable_mosaic.version = 11 : i64} {
  func.func @decoder_kernel(%arg0: memref<72x3xf32, #tpu.memory_space<vmem>>, %arg1: memref<3x512xf32, #tpu.memory_space<vmem>>, %arg2: memref<1x512xf32, #tpu.memory_space<vmem>>, %arg3: memref<512x128xf32, #tpu.memory_space<vmem>>, %arg4: memref<1x128xf32, #tpu.memory_space<vmem>>, %arg5: memref<72x128xf32, #tpu.memory_space<vmem>>) attributes {dimension_semantics = [], scalar_prefetch = 0 : i64, scratch_operands = 0 : i64, tpu.core_type = #tpu.core_type<tc>} {
    %c0 = arith.constant 0 : index
    %c0_0 = arith.constant 0 : index
    %0 = vector.load %arg0[%c0, %c0_0] : memref<72x3xf32, #tpu.memory_space<vmem>>, vector<72x3xf32>
    %c0_1 = arith.constant 0 : index
    %c0_2 = arith.constant 0 : index
    %1 = vector.load %arg1[%c0_1, %c0_2] : memref<3x512xf32, #tpu.memory_space<vmem>>, vector<3x512xf32>
    %c0_3 = arith.constant 0 : index
    %c0_4 = arith.constant 0 : index
    %2 = vector.load %arg2[%c0_3, %c0_4] : memref<1x512xf32, #tpu.memory_space<vmem>>, vector<1x512xf32>
    %3 = vector.extract_strided_slice %0 {offsets = [0, 0], sizes = [72, 1], strides = [1, 1]} : vector<72x3xf32> to vector<72x1xf32>
    %4 = vector.extract_strided_slice %1 {offsets = [0, 0], sizes = [1, 512], strides = [1, 1]} : vector<3x512xf32> to vector<1x512xf32>
    %5 = vector.broadcast %3 : vector<72x1xf32> to vector<72x512xf32>
    %6 = vector.broadcast %4 : vector<1x512xf32> to vector<72x512xf32>
    %7 = arith.mulf %5, %6 : vector<72x512xf32>
    %8 = vector.broadcast %2 : vector<1x512xf32> to vector<72x512xf32>
    %9 = arith.addf %8, %7 : vector<72x512xf32>
    %10 = vector.extract_strided_slice %0 {offsets = [0, 1], sizes = [72, 1], strides = [1, 1]} : vector<72x3xf32> to vector<72x1xf32>
    %11 = vector.extract_strided_slice %1 {offsets = [1, 0], sizes = [1, 512], strides = [1, 1]} : vector<3x512xf32> to vector<1x512xf32>
    %12 = vector.broadcast %10 : vector<72x1xf32> to vector<72x512xf32>
    %13 = vector.broadcast %11 : vector<1x512xf32> to vector<72x512xf32>
    %14 = arith.mulf %12, %13 : vector<72x512xf32>
    %15 = arith.addf %9, %14 : vector<72x512xf32>
    %16 = vector.extract_strided_slice %0 {offsets = [0, 2], sizes = [72, 1], strides = [1, 1]} : vector<72x3xf32> to vector<72x1xf32>
    %17 = vector.extract_strided_slice %1 {offsets = [2, 0], sizes = [1, 512], strides = [1, 1]} : vector<3x512xf32> to vector<1x512xf32>
    %18 = vector.broadcast %16 : vector<72x1xf32> to vector<72x512xf32>
    %19 = vector.broadcast %17 : vector<1x512xf32> to vector<72x512xf32>
    %20 = arith.mulf %18, %19 : vector<72x512xf32>
    %21 = arith.addf %15, %20 : vector<72x512xf32>
    %cst = arith.constant 0.000000e+00 : f32
    %22 = vector.broadcast %cst : f32 to vector<72x512xf32>
    %23 = arith.maximumf %21, %22 : vector<72x512xf32>
    %c0_5 = arith.constant 0 : index
    %c0_6 = arith.constant 0 : index
    %24 = vector.load %arg3[%c0_5, %c0_6] : memref<512x128xf32, #tpu.memory_space<vmem>>, vector<512x128xf32>
    %cst_7 = arith.constant dense<0.000000e+00> : vector<72x128xf32>
    %25 = tpu.matmul %23, %24, %cst_7 {dimension_numbers = #tpu.dot_dimension_numbers<[1], [0], [0], [1], [0, 0, 1, 1], [], []>} : vector<72x512xf32>, vector<512x128xf32>, vector<72x128xf32> -> vector<72x128xf32>
    %c0_8 = arith.constant 0 : index
    %c0_9 = arith.constant 0 : index
    %26 = vector.load %arg4[%c0_8, %c0_9] : memref<1x128xf32, #tpu.memory_space<vmem>>, vector<1x128xf32>
    %27 = vector.broadcast %26 : vector<1x128xf32> to vector<72x128xf32>
    %28 = arith.addf %25, %27 : vector<72x128xf32>
    %29 = arith.negf %28 : vector<72x128xf32>
    %30 = math.exp %29 : vector<72x128xf32>
    %cst_10 = arith.constant 1.000000e+00 : f32
    %31 = vector.broadcast %cst_10 : f32 to vector<72x128xf32>
    %32 = arith.addf %31, %30 : vector<72x128xf32>
    %33 = arith.divf %31, %32 : vector<72x128xf32>
    %c0_11 = arith.constant 0 : index
    %c0_12 = arith.constant 0 : index
    %34 = vector.load %arg5[%c0_11, %c0_12] : memref<72x128xf32, #tpu.memory_space<vmem>>, vector<72x128xf32>
    tpu.vector_store %arg5[%c0_11, %c0_12], %33 {strides = array<i32>} : memref<72x128xf32, #tpu.memory_space<vmem>>, vector<72x128xf32>,
    return
  }
}

</mosaic_0001>

<bundles_post_ra>
// kernel: tpu_custom_call.1
= control target key start
LH: loop header
LB: loop body
LE: loop exit
PB: predicated region body
PF: predicated region fallthrough
CT: control target
= control target key end

     0   :  { %10 = vsyncpa [#allocation3], 0  ;;  %s1580_s0 = inlined_call_operand.vmem [shape: f32[72,3], index: 0, kind: input, shape index: {}]   ;;  %s1581_s1 = inlined_call_operand.vmem [shape: f32[3,512], index: 1, kind: input, shape index: {}]   ;;  %s1582_s2 = inlined_call_operand.vmem [shape: f32[1,512], index: 2, kind: input, shape index: {}]   ;;  %s1583_s3 = inlined_call_operand.hbm [shape: f32[512,128], index: 3, kind: input, shape index: {}]   ;;  %s1584_s4 = inlined_call_operand.vmem [shape: f32[1,128], index: 4, kind: input, shape index: {}]   ;;  %s1585_s5 = inlined_call_operand.hbm [shape: f32[72,128], index: 5, kind: output, shape index: {}]  }
   0x1   :  { %11 = vsyncpa [#allocation4], 0  ;;  %s1222_s18 = smov [#allocation2]   ;;  %s1174_s22 = scalar_lea.hbm %s1583_s3, 8192 }
   0x2   :  { %s23_s19 = sshll.u32 %s1222_s18, 4  ;;  %p1175_p0 = scmp.ne.s32.totalorder %s1583_s3, %s1174_s22  ;;  %s24_s19 = int_to_ptr.vmem [resolvable:$true] %s23_s19 }
   0x3   :  { %p1178_p1 = scmp.lt.u32.totalorder %s1174_s22, %s1583_s3 }
   0x5   :  { %p1180_p2 = pnand %p1178_p1, %p1175_p0 }
   0x7   :  { %1183 = shalt.err (!%p1180_p2)
}
   0x8   :  { %s1184_s27 = scalar_lea.vmem %s24_s19, 8192  ;;  %p1189_p4 = scmp.lt.s32.totalorder %s24_s19, %s24_s19 }
   0x9   :  { %p1185_p3 = scmp.ne.s32.totalorder %s24_s19, %s1184_s27  ;;  %p1190_p5 = scmp.lt.s32.totalorder %s1184_s27, %s1184_s27 }
   0xb   :  { %p1191_p6 = por %p1190_p5, %p1189_p4 }
   0xd   :  { %p1192_p7 = pnand %p1191_p6, %p1185_p3 }
   0xf   :  { %1195 = shalt.err (!%p1192_p7)
}
  0x10   :  { %s1223_s28 = smov 128   ;;  %s1224_s29 = smov 8  }
  0x11   :  { %29 = dma.hbm_to_vmem [thread:$0]  %s1583_s3, 8192, %s24_s19, [#allocation3], %s1223_s28, %s1223_s28, %s1224_s29  }
  0x12   :  { %1218 = dma.done.wait [#allocation3], 8192  }
  0x13   :  { %1219 = vsyncadd [#allocation3], 4294959104  ;;  %v1225_v0 = vmov 0   ;;  %v1279_v1 = vld [vmem:[%s1580_s0 + $0x8] sm:$0xff]  ;;  %v1284_v2 = vld [vmem:[%s1580_s0] sm:$0xff]  ;;  %v1226_v12 = vmov 2  }
  0x14   :  { %1118 = vset.pattern.permute.xlu1 %v1225_v0  ;;  %1117 = vset.pattern.permute.xlu0 %v1225_v0  ;;  %v1291_v3 = vld [vmem:[%s1580_s0 + $0x10] sm:$0xff]  ;;  %v563_v4 = vld [vmem:[#allocation2 + $0x80] sm:$0xff]  ;;  %v564_v5 = vld [vmem:[#allocation2 + $0x88] sm:$0xff]  ;;  %v1227_v36 = vmov 1  }
  0x15   :  { %54 = vperm.xlu1 %1118, %v1279_v1   ;;  %49 = vperm.xlu0 %1117, %v1284_v2   ;;  %v595_v6 = vld [vmem:[#allocation2 + $0x180] sm:$0xff]  ;;  %v1296_v7 = vld [vmem:[%s1580_s0 + $0x18] sm:$0xff]  ;;  %v1046_v8 = vpack.c.bf16 %v564_v5, %v563_v4  ;;  %v596_v9 = vld [vmem:[#allocation2 + $0x188] sm:$0xff] }
  0x16   :  { %v547_v10 = vld [vmem:[#allocation2] sm:$0xff]  ;;  %v548_v11 = vld [vmem:[#allocation2 + $0x8] sm:$0xff]  ;;  %v1078_v13 = vpack.c.bf16 %v596_v9, %v595_v6  ;;  %v565_v17 = vld [vmem:[#allocation2 + $0x90] sm:$0xff] }
  0x17   :  { %v1048_v14 = vpack.c.bf16 %v548_v11, %v547_v10  ;;  %v579_v15 = vld [vmem:[#allocation2 + $0x100] sm:$0xff]  ;;  %v580_v16 = vld [vmem:[#allocation2 + $0x108] sm:$0xff]  ;;  %1047 = vmatprep.subr.bf16.mxu0 %v1046_v8  ;;  %v566_v19 = vld [vmem:[#allocation2 + $0x98] sm:$0xff] }
  0x18   :  { %v1080_v18 = vpack.c.bf16 %v580_v16, %v579_v15  ;;  %v597_v20 = vld [vmem:[#allocation2 + $0x190] sm:$0xff]  ;;  %v598_v21 = vld [vmem:[#allocation2 + $0x198] sm:$0xff]  ;;  %1079 = vmatprep.subr.bf16.mxu1 %v1078_v13  ;;  %v1050_v22 = vpack.c.bf16 %v566_v19, %v565_v17  ;;  %v567_v29 = vld [vmem:[#allocation2 + $0xa0] sm:$0xff] }
  0x19   :  { %1119 = vset.pattern.permute.xlu1 %v1226_v12  ;;  %59 = vperm.xlu0 %1117, %v1291_v3   ;;  %v1082_v23 = vpack.c.bf16 %v598_v21, %v597_v20  ;;  %v549_v24 = vld [vmem:[#allocation2 + $0x10] sm:$0xff]  ;;  %v550_v25 = vld [vmem:[#allocation2 + $0x18] sm:$0xff]  ;;  %v568_v30 = vld [vmem:[#allocation2 + $0xa8] sm:$0xff] }
  0x1a   :  { %368 = vperm.xlu1 %1119, %v1284_v2   ;;  %1049 = vmatpush3.bf16.msra.mxu0 %v1048_v14  ;;  %v581_v26 = vld [vmem:[#allocation2 + $0x110] sm:$0xff]  ;;  %v1052_v27 = vpack.c.bf16 %v550_v25, %v549_v24  ;;  %v582_v28 = vld [vmem:[#allocation2 + $0x118] sm:$0xff]  ;;  %v1054_v32 = vpack.c.bf16 %v568_v30, %v567_v29  ;;  %v599_v33 = vld [vmem:[#allocation2 + $0x1a0] sm:$0xff] }
  0x1b   :  { %1081 = vmatpush3.bf16.msra.mxu1 %v1080_v18  ;;  %1051 = vmatprep.subr.bf16.mxu0 %v1050_v22  ;;  %v1084_v31 = vpack.c.bf16 %v582_v28, %v581_v26  ;;  %v600_v34 = vld [vmem:[#allocation2 + $0x1a8] sm:$0xff]  ;;  %v551_v35 = vld [vmem:[#allocation2 + $0x20] sm:$0xff]  ;;  %v569_v43 = vld [vmem:[#allocation2 + $0xb0] sm:$0xff] }
  0x1c   :  { %1083 = vmatprep.subr.bf16.mxu1 %v1082_v23  ;;  %v1086_v37 = vpack.c.bf16 %v600_v34, %v599_v33  ;;  %v552_v38 = vld [vmem:[#allocation2 + $0x28] sm:$0xff]  ;;  %v583_v39 = vld [vmem:[#allocation2 + $0x120] sm:$0xff]  ;;  %v570_v44 = vld [vmem:[#allocation2 + $0xb8] sm:$0xff] }
  0x1d   :  { %64 = vperm.xlu0 %1117, %v1296_v7   ;;  %v584_v40 = vld [vmem:[#allocation2 + $0x128] sm:$0xff]  ;;  %v1056_v41 = vpack.c.bf16 %v552_v38, %v551_v35  ;;  %v601_v45 = vld [vmem:[#allocation2 + $0x1b0] sm:$0xff]  ;;  %v602_v46 = vld [vmem:[#allocation2 + $0x1b8] sm:$0xff]  ;;  %v1058_v52 = vpack.c.bf16 %v570_v44, %v569_v43 }
  0x1e   :  { %1120 = vset.pattern.permute.xlu1 %v1227_v36  ;;  %1053 = vmatpush3.bf16.msra.mxu0 %v1052_v27  ;;  %v1088_v42 = vpack.c.bf16 %v584_v40, %v583_v39  ;;  %v553_v47 = vld [vmem:[#allocation2 + $0x30] sm:$0xff]  ;;  %v554_v48 = vld [vmem:[#allocation2 + $0x38] sm:$0xff]  ;;  %v571_v51 = vld [vmem:[#allocation2 + $0xc0] sm:$0xff]  ;;  %v1090_v56 = vpack.c.bf16 %v602_v46, %v601_v45 }
  0x1f   :  { %228 = vperm.xlu1 %1120, %v1279_v1   ;;  %1085 = vmatpush3.bf16.msra.mxu1 %v1084_v31  ;;  %v585_v49 = vld [vmem:[#allocation2 + $0x130] sm:$0xff]  ;;  %v586_v50 = vld [vmem:[#allocation2 + $0x138] sm:$0xff]  ;;  %v572_v53 = vld [vmem:[#allocation2 + $0xc8] sm:$0xff]  ;;  %v1060_v57 = vpack.c.bf16 %v554_v48, %v553_v47  ;;  %v94_v47 = vlaneseq }
  0x20   :  { %1055 = vmatprep.subr.bf16.mxu0 %v1054_v32  ;;  %1087 = vmatprep.subr.bf16.mxu1 %v1086_v37  ;;  %v603_v54 = vld [vmem:[#allocation2 + $0x1c0] sm:$0xff]  ;;  %v604_v55 = vld [vmem:[#allocation2 + $0x1c8] sm:$0xff]  ;;  %v1092_v58 = vpack.c.bf16 %v586_v50, %v585_v49  ;;  %v1062_v62 = vpack.c.bf16 %v572_v53, %v571_v51  ;;  %v574_v4 = vld [vmem:[#allocation2 + $0xd8] sm:$0xff] }
  0x21   :  { %1123 = vset.pattern.permute.xlu0 %v1227_v36  ;;  %v555_v59 = vld [vmem:[#allocation2 + $0x40] sm:$0xff]  ;;  %v556_v60 = vld [vmem:[#allocation2 + $0x48] sm:$0xff]  ;;  %v1094_v5 = vpack.c.bf16 %v604_v55, %v603_v54  ;;  %v605_v6 = vld [vmem:[#allocation2 + $0x1d0] sm:$0xff]  ;;  %v95_v48 = vshrl.u32 %v94_v47, 7 }
  0x22   :  { %224 = vperm.xlu0 %1123, %v1284_v2   ;;  %1057 = vmatpush3.bf16.msra.mxu0 %v1056_v41  ;;  %v587_v61 = vld [vmem:[#allocation2 + $0x140] sm:$0xff]  ;;  %v588_v63 = vld [vmem:[#allocation2 + $0x148] sm:$0xff]  ;;  %v573_v2 = vld [vmem:[#allocation2 + $0xd0] sm:$0xff]  ;;  %v1064_v9 = vpack.c.bf16 %v556_v60, %v555_v59 }
  0x23   :  { %1121 = vset.pattern.permute.xlu1 %v1226_v12  ;;  %1089 = vmatpush3.bf16.msra.mxu1 %v1088_v42  ;;  %v606_v8 = vld [vmem:[#allocation2 + $0x1d8] sm:$0xff]  ;;  %v1096_v10 = vpack.c.bf16 %v588_v63, %v587_v61  ;;  %v1066_v11 = vpack.c.bf16 %v574_v4, %v573_v2  ;;  %v557_v13 = vld [vmem:[#allocation2 + $0x50] sm:$0xff]  ;;  %v575_v18 = vld [vmem:[#allocation2 + $0xe0] sm:$0xff]  ;;  %v96_v49 = vsub.s32 0, %v95_v48  ;;  %v100_v50 = vsub.s32 4, %v95_v48 }
  0x24   :  { %372 = vperm.xlu1 %1121, %v1279_v1   ;;  %1059 = vmatprep.subr.bf16.mxu0 %v1058_v52  ;;  %v39_v1 = vld [vmem:[%s1580_s0 + $0x20] sm:$0xff]  ;;  %v558_v14 = vld [vmem:[#allocation2 + $0x58] sm:$0xff]  ;;  %v589_v15 = vld [vmem:[#allocation2 + $0x150] sm:$0xff]  ;;  %v1098_v16 = vpack.c.bf16 %v606_v8, %v605_v6  ;;  %v177_v55 = vsub.s32 2, %v95_v48  ;;  %v409_v61 = vsub.s32 6, %v95_v48 }
  0x25   :  { %1091 = vmatprep.subr.bf16.mxu1 %v1090_v56  ;;  %v590_v17 = vld [vmem:[#allocation2 + $0x158] sm:$0xff]  ;;  %v576_v19 = vld [vmem:[#allocation2 + $0xe8] sm:$0xff]  ;;  %v607_v20 = vld [vmem:[#allocation2 + $0x1e0] sm:$0xff]  ;;  %v1068_v22 = vpack.c.bf16 %v558_v14, %v557_v13  ;;  %v265_v56 = vsub.s32 5, %v95_v48 }
  0x26   :  { %236 = vperm.xlu0 %1123, %v1296_v7   ;;  %1061 = vmatpush3.bf16.msra.mxu0 %v1060_v57  ;;  %v608_v21 = vld [vmem:[#allocation2 + $0x1e8] sm:$0xff]  ;;  %v1100_v23 = vpack.c.bf16 %v590_v17, %v589_v15  ;;  %v1070_v24 = vpack.c.bf16 %v576_v19, %v575_v18  ;;  %v559_v25 = vld [vmem:[#allocation2 + $0x60] sm:$0xff]  ;;  %v577_v30 = vld [vmem:[#allocation2 + $0xf0] sm:$0xff] }
  0x27   :  { %1093 = vmatpush3.bf16.msra.mxu1 %v1092_v58  ;;  %1063 = vmatprep.subr.bf16.mxu0 %v1062_v62  ;;  %v560_v26 = vld [vmem:[#allocation2 + $0x68] sm:$0xff]  ;;  %v1102_v27 = vpack.c.bf16 %v608_v21, %v607_v20  ;;  %v591_v28 = vld [vmem:[#allocation2 + $0x160] sm:$0xff]  ;;  %v578_v31 = vld [vmem:[#allocation2 + $0xf8] sm:$0xff]  ;;  %v181_v58 = vsub.s32 3, %v95_v48 }
  0x28   :  { %1122 = vset.pattern.permute.xlu1 %v1227_v36  ;;  %1095 = vmatprep.subr.bf16.mxu1 %v1094_v5  ;;  %v592_v29 = vld [vmem:[#allocation2 + $0x168] sm:$0xff]  ;;  %v609_v32 = vld [vmem:[#allocation2 + $0x1f0] sm:$0xff]  ;;  %v610_v33 = vld [vmem:[#allocation2 + $0x1f8] sm:$0xff]  ;;  %v1072_v34 = vpack.c.bf16 %v560_v26, %v559_v25  ;;  %v1074_v38 = vpack.c.bf16 %v578_v31, %v577_v30 }
  0x29   :  { %232 = vperm.xlu1 %1122, %v1291_v3   ;;  %v1104_v35 = vpack.c.bf16 %v592_v29, %v591_v28  ;;  %v40_v37 = vld [vmem:[%s1580_s0 + $0x28] sm:$0xff]  ;;  %v1106_v39 = vpack.c.bf16 %v610_v33, %v609_v32  ;;  %v561_v40 = vld [vmem:[#allocation2 + $0x70] sm:$0xff]  ;;  %v594_v42 = vld [vmem:[#allocation2 + $0x178] sm:$0xff] }
  0x2a   :  { %240 = vperm.xlu0 %1123, %v39_v1   ;;  %1065 = vmatpush3.bf16.msra.mxu0 %v1064_v9  ;;  %v593_v41 = vld [vmem:[#allocation2 + $0x170] sm:$0xff]  ;;  %v42_v43 = vld [vmem:[%s1580_s0 + $0x38] sm:$0xff]  ;;  %v43_v46 = vld [vmem:[%s1580_s0 + $0x40] sm:$0xff] }
  0x2b   :  { %1097 = vmatpush3.bf16.msra.mxu1 %v1096_v10  ;;  %1067 = vmatprep.subr.bf16.mxu0 %v1066_v11  ;;  %v1108_v45 = vpack.c.bf16 %v594_v42, %v593_v41  ;;  %v45_v51 = vld [vmem:[%s1581_s1 + $0x8] sm:$0x77]  ;;  %v46_v57 = vld [vmem:[%s1582_s2] sm:$0xf] }
  0x2c   :  { %1099 = vmatprep.subr.bf16.mxu1 %v1098_v16  ;;  %v109_v54 = vrot.slane %v45_v51, %v100_v50  ;;  %v414_v6 = vrot.slane %v45_v51, %v177_v55  ;;  %v1359_v8 = vrot.slane %v46_v57, %v96_v49  ;;  %v1363_v11 = vrot.slane %v46_v57, %v177_v55 }
  0x2d   :  { %1124 = vset.pattern.permute.xlu1 %v1226_v12  ;;  %v1365_v13 = vrot.slane %v46_v57, %v181_v58  ;;  %v274_v15 = vrot.slane %v45_v51, %v265_v56  ;;  %v418_v19 = vrot.slane %v45_v51, %v409_v61 }
  0x2e   :  { %376 = vperm.xlu1 %1124, %v1291_v3   ;;  %1128 = vset.pattern.permute.xlu0 %v1226_v12  ;;  %v562_v3 = vld [vmem:[#allocation2 + $0x78] sm:$0xff]  ;;  %v1357_v63 = vrot.slane %v109_v54, %v96_v49 }
  0x2f   :  { %384 = vperm.xlu0 %1128, %v39_v1   ;;  %1069 = vmatpush3.bf16.msra.mxu0 %v1068_v22  ;;  %v1076_v44 = vpack.c.bf16 %v562_v3, %v561_v40 }
  0x30   :  { %1101 = vmatpush3.bf16.msra.mxu1 %v1100_v23  ;;  %1071 = vmatprep.subr.bf16.mxu0 %v1070_v24  ;;  %v1373_v23 = vrot.slane %v414_v6, %v177_v55 }
  0x31   :  { %1103 = vmatprep.subr.bf16.mxu1 %v1102_v27 }
  0x32   :  { %1125 = vset.pattern.permute.xlu1 %v1225_v0 }
  0x33   :  { %69 = vperm.xlu1 %1125, %v39_v1   ;;  %388 = vperm.xlu0 %1128, %v40_v37  }
  0x34   :  { %1073 = vmatpush3.bf16.msra.mxu0 %v1072_v34  ;;  %1105 = vmatpush3.bf16.msra.mxu1 %v1104_v35 }
  0x35   :  { %1075 = vmatprep.subr.bf16.mxu0 %v1074_v38  ;;  %1107 = vmatprep.subr.bf16.mxu1 %v1106_v39  ;;  %v1391_v38 = vrot.slane %v418_v19, %v177_v55 }
  0x37   :  { %1126 = vset.pattern.permute.xlu1 %v1226_v12  ;;  %1132 = vset.pattern.permute.xlu0 %v1225_v0 }
  0x38   :  { %380 = vperm.xlu1 %1126, %v1296_v7   ;;  %84 = vperm.xlu0 %1132, %v42_v43   ;;  %v41_v7 = vld [vmem:[%s1580_s0 + $0x30] sm:$0xff] }
  0x39   :  { %1077 = vmatpush3.bf16.msra.mxu0 %v1076_v44  ;;  %1109 = vmatpush3.bf16.msra.mxu1 %v1108_v45 }
  0x3c   :  { %1127 = vset.pattern.permute.xlu1 %v1225_v0  ;;  %89 = vperm.xlu0 %1132, %v43_v46  }
  0x3d   :  { %74 = vperm.xlu1 %1127, %v40_v37  }
  0x40   :  { %1136 = vset.pattern.permute.xlu0 %v1227_v36 }
  0x41   :  { %1129 = vset.pattern.permute.xlu1 %v1227_v36  ;;  %256 = vperm.xlu0 %1136, %v43_v46  }
  0x42   :  { %244 = vperm.xlu1 %1129, %v40_v37  }
  0x45   :  { %1137 = vset.pattern.permute.xlu0 %v1226_v12 }
  0x46   :  { %1130 = vset.pattern.permute.xlu1 %v1225_v0  ;;  %v44_v0 = vld [vmem:[%s1581_s1] sm:$0x77] }
  0x47   :  { %79 = vperm.xlu1 %1130, %v41_v7   ;;  %v97_v52 = vrot.slane %v44_v0, %v96_v49  ;;  %v101_v53 = vrot.slane %v44_v0, %v100_v50  ;;  %v406_v5 = vrot.slane %v44_v0, %v177_v55  ;;  %v266_v10 = vrot.slane %v44_v0, %v265_v56 }
  0x48   :  { %v410_v18 = vrot.slane %v44_v0, %v409_v61 }
  0x49   :  { %v1351_v59 = vrot.slane %v97_v52, %v96_v49  ;;  %v1353_v60 = vrot.slane %v101_v53, %v96_v49  ;;  %v1371_v22 = vrot.slane %v406_v5, %v177_v55 }
  0x4a   :  { %v1389_v37 = vrot.slane %v410_v18, %v177_v55 }
  0x4b   :  { %1131 = vset.pattern.permute.xlu1 %v1227_v36 }
  0x4c   :  { %248 = vperm.xlu1 %1131, %v41_v7  }
  0x50   :  { %1133 = vset.pattern.permute.xlu1 %v1226_v12 }
  0x51   :  { %392 = vperm.xlu1 %1133, %v41_v7  }
  0x55   :  { %1134 = vset.pattern.permute.xlu1 %v1227_v36  ;;  %v105_v36 = vrot.slane %v45_v51, %v96_v49 }
  0x56   :  { %252 = vperm.xlu1 %1134, %v42_v43  }
  0x57   :  { %v1355_v62 = vrot.slane %v105_v36, %v96_v49 }
  0x5a   :  { %1135 = vset.pattern.permute.xlu1 %v1226_v12  ;;  %v173_v12 = vsub.s32 1, %v95_v48 }
  0x5b   :  { %396 = vperm.xlu1 %1135, %v42_v43  }
  0x5c   :  { %v1361_v1 = vrot.slane %v46_v57, %v173_v12  ;;  %v262_v9 = vrot.slane %v44_v0, %v173_v12  ;;  %v270_v14 = vrot.slane %v45_v51, %v173_v12  ;;  %v1379_v29 = vrot.slane %v266_v10, %v173_v12 }
  0x5d   :  { %v1385_v33 = vrot.slane %v274_v15, %v173_v12 }
  0x5e   :  { %v1377_v28 = vrot.slane %v262_v9, %v173_v12  ;;  %v1383_v32 = vrot.slane %v270_v14, %v173_v12 }
  0x5f   :  { %400 = vperm.xlu1 %1135, %v43_v46  }
  0x94   :  { %v55_v2 = vpop.permute.xlu1 %54  ;;  %v50_v4 = vpop.permute.xlu0 %49 }
  0x95   :  { %v134_v16 = vmul.f32 %v1351_v59, %v55_v2  ;;  %v135_v17 = vmul.f32 %v1353_v60, %v55_v2  ;;  %v136_v20 = vmul.f32 %v1355_v62, %v55_v2  ;;  %v137_v21 = vmul.f32 %v1357_v63, %v55_v2 }
  0x96   :  { %v130_v25 = vmul.f32 %v1351_v59, %v50_v4  ;;  %v132_v26 = vmul.f32 %v1355_v62, %v50_v4  ;;  %v131_v30 = vmul.f32 %v1353_v60, %v50_v4  ;;  %v133_v31 = vmul.f32 %v1357_v63, %v50_v4 }
  0x97   :  { %v191_v34 = vadd.f32 %v1359_v8, %v134_v16  ;;  %v192_v35 = vadd.f32 %v1361_v1, %v135_v17  ;;  %v193_v39 = vadd.f32 %v1363_v11, %v136_v20  ;;  %v194_v40 = vadd.f32 %v1365_v13, %v137_v21 }
  0x98   :  { %v60_v24 = vpop.permute.xlu0 %59  ;;  %v187_v43 = vadd.f32 %v1359_v8, %v130_v25  ;;  %v189_v44 = vadd.f32 %v1363_v11, %v132_v26  ;;  %v188_v49 = vadd.f32 %v1361_v1, %v131_v30  ;;  %v190_v50 = vadd.f32 %v1365_v13, %v133_v31 }
  0x99   :  { %v369_v27 = vpop.permute.xlu1 %368  ;;  %v138_v3 = vmul.f32 %v1351_v59, %v60_v24  ;;  %v139_v41 = vmul.f32 %v1353_v60, %v60_v24  ;;  %v140_v45 = vmul.f32 %v1355_v62, %v60_v24  ;;  %v141_v46 = vmul.f32 %v1357_v63, %v60_v24 }
  0x9a   :  { %v439_v7 = vmul.f32 %v1371_v22, %v369_v27  ;;  %v441_v47 = vmul.f32 %v1373_v23, %v369_v27  ;;  %v440_v55 = vmul.f32 %v1389_v37, %v369_v27  ;;  %v442_v12 = vmul.f32 %v1391_v38, %v369_v27 }
  0x9b   :  { %v1410_v36 = vadd.f32 %v1359_v8, %v138_v3  ;;  %v196_v54 = vadd.f32 %v1361_v1, %v139_v41  ;;  %v1416_v56 = vadd.f32 %v1363_v11, %v140_v45  ;;  %v1419_v57 = vadd.f32 %v1365_v13, %v141_v46 }
  0x9c   :  { %v65_v42 = vpop.permute.xlu0 %64 }
  0x9d   :  { %v142_v0 = vmul.f32 %v1351_v59, %v65_v42  ;;  %v143_v51 = vmul.f32 %v1353_v60, %v65_v42  ;;  %v144_v52 = vmul.f32 %v1355_v62, %v65_v42  ;;  %v145_v53 = vmul.f32 %v1357_v63, %v65_v42 }
  0x9e   :  { %v229_v48 = vpop.permute.xlu1 %228 }
  0x9f   :  { %v300_v58 = vmul.f32 %v1379_v29, %v229_v48  ;;  %v302_v61 = vmul.f32 %v1385_v33, %v229_v48  ;;  %v1428_v10 = vadd.f32 %v1359_v8, %v142_v0  ;;  %v1431_v14 = vadd.f32 %v1361_v1, %v143_v51 }
  0xa0   :  { %v1434_v15 = vadd.f32 %v1363_v11, %v144_v52  ;;  %v1437_v16 = vadd.f32 %v1365_v13, %v145_v53  ;;  %v299_v18 = vmul.f32 %v1377_v28, %v229_v48  ;;  %v301_v19 = vmul.f32 %v1383_v32, %v229_v48 }
  0xa1   :  { %v225_v2 = vpop.permute.xlu0 %224  ;;  %v336_v41 = vadd.f32 %v300_v58, %v192_v35  ;;  %v338_v42 = vadd.f32 %v302_v61, %v194_v40 }
  0xa2   :  { %v295_v4 = vmul.f32 %v1377_v28, %v225_v2  ;;  %v297_v5 = vmul.f32 %v1383_v32, %v225_v2  ;;  %v296_v6 = vmul.f32 %v1379_v29, %v225_v2  ;;  %v298_v9 = vmul.f32 %v1385_v33, %v225_v2  ;;  %1586 = vst [vmem:[#allocation8_spill] sm:$0xff] %v1434_v15 }
  0xa3   :  { %v373_v17 = vpop.permute.xlu1 %372  ;;  %v335_v2 = vadd.f32 %v299_v18, %v191_v34  ;;  %v337_v15 = vadd.f32 %v301_v19, %v193_v39 }
  0xa4   :  { %v444_v20 = vmul.f32 %v1389_v37, %v373_v17  ;;  %v446_v21 = vmul.f32 %v1391_v38, %v373_v17  ;;  %v332_v24 = vadd.f32 %v296_v6, %v188_v49  ;;  %v334_v25 = vadd.f32 %v298_v9, %v190_v50 }
  0xa5   :  { %v331_v26 = vadd.f32 %v295_v4, %v187_v43  ;;  %v333_v27 = vadd.f32 %v297_v5, %v189_v44  ;;  %v237_v30 = vpop.permute.xlu0 %236  ;;  %v443_v31 = vmul.f32 %v1371_v22, %v373_v17  ;;  %v445_v3 = vmul.f32 %v1373_v23, %v373_v17 }
  0xa6   :  { %v476_v45 = vadd.f32 %v440_v55, %v332_v24  ;;  %v478_v46 = vadd.f32 %v442_v12, %v334_v25  ;;  %v480_v52 = vadd.f32 %v444_v20, %v336_v41  ;;  %v482_v53 = vadd.f32 %v446_v21, %v338_v42 }
  0xa7   :  { %v475_v0 = vadd.f32 %v439_v7, %v331_v26  ;;  %v477_v51 = vadd.f32 %v441_v47, %v333_v27  ;;  %v1448_v44 = vmul.f32 %v1377_v28, %v237_v30  ;;  %v308_v50 = vmul.f32 %v1379_v29, %v237_v30 }
  0xa8   :  { %v233_v48 = vpop.permute.xlu1 %232  ;;  %v512_v40 = vmax.f32 %v476_v45, 0.0  ;;  %v514_v55 = vmax.f32 %v478_v46, 0.0  ;;  %v479_v34 = vadd.f32 %v443_v31, %v335_v2  ;;  %v481_v39 = vadd.f32 %v445_v3, %v337_v15 }
  0xa9   :  { %v303_v49 = vmul.f32 %v1377_v28, %v233_v48  ;;  %v304_v43 = vmul.f32 %v1379_v29, %v233_v48  ;;  %v241_v35 = vpop.permute.xlu0 %240  ;;  %v511_v12 = vmax.f32 %v475_v0, 0.0  ;;  %v513_v7 = vmax.f32 %v477_v51, 0.0 }
  0xaa   :  { %v305_v47 = vmul.f32 %v1383_v32, %v233_v48  ;;  %v306_v58 = vmul.f32 %v1385_v33, %v233_v48  ;;  %682 = vmatprep.mubr.f32.mxu0 %v512_v40  ;;  %792 = vmatprep.mubr.f32.mxu1 %v514_v55  ;;  %v516_v61 = vmax.f32 %v480_v52, 0.0  ;;  %v518_v4 = vmax.f32 %v482_v53, 0.0 }
  0xab   :  { %v309_v5 = vmul.f32 %v1383_v32, %v237_v30  ;;  %v310_v6 = vmul.f32 %v1385_v33, %v237_v30  ;;  %683 = vmatmul.mubr.f32.vlgmr.msra.gmra.mrb[0].mxu0 %v511_v12  ;;  %793 = vmatmul.mubr.f32.vlgmr.msra.gmra.mrb[0].mxu1 %v513_v7  ;;  %v311_v17 = vmul.f32 %v1377_v28, %v241_v35  ;;  %v515_v24 = vmax.f32 %v479_v34, 0.0 }
  0xac   :  { %v340_v18 = vadd.f32 %v304_v43, %v196_v54  ;;  %v339_v19 = vadd.f32 %v303_v49, %v1410_v36  ;;  %687 = vmatprep.mubr.f32.mxu0 %v516_v61  ;;  %797 = vmatprep.mubr.f32.mxu1 %v518_v4  ;;  %v517_v26 = vmax.f32 %v481_v39, 0.0  ;;  %v342_v27 = vadd.f32 %v306_v58, %v1419_v57  ;;  %v1587_v4 = vld [vmem:[#allocation8_spill] sm:$0xff] }
  0xad   :  { %v377_v9 = vpop.permute.xlu1 %376  ;;  %v341_v30 = vadd.f32 %v305_v47, %v1416_v56  ;;  %v312_v54 = vmul.f32 %v1379_v29, %v241_v35  ;;  %v313_v36 = vmul.f32 %v1383_v32, %v241_v35  ;;  %v314_v42 = vmul.f32 %v1385_v33, %v241_v35 }
  0xae   :  { %v447_v15 = vmul.f32 %v1371_v22, %v377_v9  ;;  %v448_v20 = vmul.f32 %v1389_v37, %v377_v9  ;;  %v449_v21 = vmul.f32 %v1373_v23, %v377_v9  ;;  %v450_v25 = vmul.f32 %v1391_v38, %v377_v9  ;;  %v385_v31 = vpop.permute.xlu0 %384 }
  0xaf   :  { %688 = vmatmul.mubr.f32.gmra.mrb[2].mxu0 %v515_v24  ;;  %798 = vmatmul.mubr.f32.gmra.mrb[2].mxu1 %v517_v26  ;;  %v455_v57 = vmul.f32 %v1371_v22, %v385_v31  ;;  %v456_v56 = vmul.f32 %v1389_v37, %v385_v31  ;;  %v457_v40 = vmul.f32 %v1373_v23, %v385_v31 }
  0xb0   :  { %v484_v3 = vadd.f32 %v448_v20, %v340_v18  ;;  %v483_v41 = vadd.f32 %v447_v15, %v339_v19  ;;  %v486_v45 = vadd.f32 %v450_v25, %v342_v27  ;;  %v485_v46 = vadd.f32 %v449_v21, %v341_v30 }
  0xb1   :  { %v458_v55 = vmul.f32 %v1391_v38, %v385_v31  ;;  %v344_v34 = vadd.f32 %v308_v50, %v1431_v14  ;;  %v346_v39 = vadd.f32 %v310_v6, %v1437_v16  ;;  %v343_v61 = vadd.f32 %v1448_v44, %v1428_v10 }
  0xb2   :  { %v70_v0 = vpop.permute.xlu1 %69  ;;  %v520_v51 = vmax.f32 %v484_v3, 0.0  ;;  %v519_v48 = vmax.f32 %v483_v41, 0.0  ;;  %v522_v43 = vmax.f32 %v486_v45, 0.0  ;;  %v521_v35 = vmax.f32 %v485_v46, 0.0  ;;  %v389_v41 = vpop.permute.xlu0 %388 }
  0xb3   :  { %v146_v52 = vmul.f32 %v1351_v59, %v70_v0  ;;  %v147_v53 = vmul.f32 %v1353_v60, %v70_v0  ;;  %v148_v2 = vmul.f32 %v1355_v62, %v70_v0  ;;  %v149_v49 = vmul.f32 %v1357_v63, %v70_v0 }
  0xb4   :  { %692 = vmatprep.mubr.f32.mxu0 %v520_v51  ;;  %802 = vmatprep.mubr.f32.mxu1 %v522_v43  ;;  %v345_v9 = vadd.f32 %v309_v5, %v1587_v4 }
  0xb5   :  { %v203_v12 = vadd.f32 %v1359_v8, %v146_v52  ;;  %v204_v7 = vadd.f32 %v1361_v1, %v147_v53  ;;  %v205_v47 = vadd.f32 %v1363_v11, %v148_v2  ;;  %v206_v58 = vadd.f32 %v1365_v13, %v149_v49  ;;  %693 = vmatmul.mubr.f32.gmra.mrb[4].mxu0 %v519_v48 }
  0xb6   :  { %803 = vmatmul.mubr.f32.gmra.mrb[4].mxu1 %v521_v35  ;;  %v461_v2 = vmul.f32 %v1373_v23, %v389_v41  ;;  %v462_v49 = vmul.f32 %v1391_v38, %v389_v41 }
  0xb7   :  { %v381_v18 = vpop.permute.xlu1 %380  ;;  %v348_v19 = vadd.f32 %v312_v54, %v204_v7  ;;  %v350_v15 = vadd.f32 %v314_v42, %v206_v58  ;;  %v347_v20 = vadd.f32 %v311_v17, %v203_v12  ;;  %v349_v21 = vadd.f32 %v313_v36, %v205_v47 }
  0xb8   :  { %v451_v24 = vmul.f32 %v1371_v22, %v381_v18  ;;  %v452_v25 = vmul.f32 %v1389_v37, %v381_v18  ;;  %v453_v26 = vmul.f32 %v1373_v23, %v381_v18  ;;  %v454_v14 = vmul.f32 %v1391_v38, %v381_v18 }
  0xb9   :  { %v492_v16 = vadd.f32 %v456_v56, %v348_v19  ;;  %v494_v5 = vadd.f32 %v458_v55, %v350_v15  ;;  %v491_v27 = vadd.f32 %v455_v57, %v347_v20  ;;  %v493_v30 = vadd.f32 %v457_v40, %v349_v21 }
  0xba   :  { %v488_v50 = vadd.f32 %v452_v25, %v344_v34  ;;  %v490_v6 = vadd.f32 %v454_v14, %v346_v39  ;;  %v487_v10 = vadd.f32 %v451_v24, %v343_v61  ;;  %v489_v44 = vadd.f32 %v453_v26, %v345_v9 }
  0xbb   :  { %v528_v51 = vmax.f32 %v492_v16, 0.0  ;;  %v530_v48 = vmax.f32 %v494_v5, 0.0  ;;  %v459_v57 = vmul.f32 %v1371_v22, %v389_v41  ;;  %v460_v56 = vmul.f32 %v1389_v37, %v389_v41 }
  0xbc   :  { %v75_v31 = vpop.permute.xlu1 %74  ;;  %v524_v54 = vmax.f32 %v488_v50, 0.0  ;;  %v526_v17 = vmax.f32 %v490_v6, 0.0  ;;  %v523_v36 = vmax.f32 %v487_v10, 0.0  ;;  %v525_v3 = vmax.f32 %v489_v44, 0.0  ;;  %v85_v44 = vpop.permute.xlu0 %84 }
  0xbd   :  { %v150_v42 = vmul.f32 %v1351_v59, %v75_v31  ;;  %v151_v45 = vmul.f32 %v1353_v60, %v75_v31  ;;  %v152_v46 = vmul.f32 %v1355_v62, %v75_v31  ;;  %v153_v0 = vmul.f32 %v1357_v63, %v75_v31 }
  0xbe   :  { %697 = vmatprep.mubr.f32.mxu0 %v524_v54  ;;  %807 = vmatprep.mubr.f32.mxu1 %v526_v17  ;;  %v527_v52 = vmax.f32 %v491_v27, 0.0  ;;  %v529_v53 = vmax.f32 %v493_v30, 0.0  ;;  %v158_v17 = vmul.f32 %v1351_v59, %v85_v44 }
  0xbf   :  { %698 = vmatmul.mubr.f32.gmra.mrb[6].mxu0 %v523_v36  ;;  %808 = vmatmul.mubr.f32.gmra.mrb[6].mxu1 %v525_v3  ;;  %v207_v43 = vadd.f32 %v1359_v8, %v150_v42  ;;  %v208_v35 = vadd.f32 %v1361_v1, %v151_v45  ;;  %v209_v40 = vadd.f32 %v1363_v11, %v152_v46 }
  0xc0   :  { %702 = vmatprep.mubr.f32.mxu0 %v528_v51  ;;  %v210_v55 = vadd.f32 %v1365_v13, %v153_v0  ;;  %812 = vmatprep.mubr.f32.mxu1 %v530_v48  ;;  %v159_v36 = vmul.f32 %v1353_v60, %v85_v44  ;;  %v160_v3 = vmul.f32 %v1355_v62, %v85_v44  ;;  %v90_v48 = vpop.permute.xlu0 %89 }
  0xc1   :  { %v245_v12 = vpop.permute.xlu1 %244  ;;  %v161_v0 = vmul.f32 %v1357_v63, %v85_v44 }
  0xc2   :  { %v315_v7 = vmul.f32 %v1377_v28, %v245_v12  ;;  %v316_v47 = vmul.f32 %v1379_v29, %v245_v12  ;;  %v317_v58 = vmul.f32 %v1383_v32, %v245_v12  ;;  %v318_v34 = vmul.f32 %v1385_v33, %v245_v12 }
  0xc3   :  { %703 = vmatmul.mubr.f32.gmra.mrb[8].mxu0 %v527_v52  ;;  %813 = vmatmul.mubr.f32.gmra.mrb[8].mxu1 %v529_v53  ;;  %v217_v12 = vadd.f32 %v1363_v11, %v160_v3 }
  0xc4   :  { %v352_v39 = vadd.f32 %v316_v47, %v208_v35  ;;  %v354_v61 = vadd.f32 %v318_v34, %v210_v55  ;;  %v351_v4 = vadd.f32 %v315_v7, %v207_v43  ;;  %v353_v9 = vadd.f32 %v317_v58, %v209_v40 }
  0xc5   :  { %v215_v40 = vadd.f32 %v1359_v8, %v158_v17  ;;  %v216_v55 = vadd.f32 %v1361_v1, %v159_v36  ;;  %v162_v7 = vmul.f32 %v1351_v59, %v90_v48 }
  0xc6   :  { %v80_v18 = vpop.permute.xlu1 %79  ;;  %v496_v19 = vadd.f32 %v460_v56, %v352_v39  ;;  %v498_v15 = vadd.f32 %v462_v49, %v354_v61  ;;  %v495_v20 = vadd.f32 %v459_v57, %v351_v4  ;;  %v497_v21 = vadd.f32 %v461_v2, %v353_v9 }
  0xc7   :  { %v154_v16 = vmul.f32 %v1351_v59, %v80_v18  ;;  %v155_v50 = vmul.f32 %v1353_v60, %v80_v18  ;;  %v156_v6 = vmul.f32 %v1355_v62, %v80_v18  ;;  %v157_v10 = vmul.f32 %v1357_v63, %v80_v18 }
  0xc8   :  { %v532_v24 = vmax.f32 %v496_v19, 0.0  ;;  %v534_v25 = vmax.f32 %v498_v15, 0.0  ;;  %v531_v26 = vmax.f32 %v495_v20, 0.0  ;;  %v533_v14 = vmax.f32 %v497_v21, 0.0 }
  0xc9   :  { %v211_v41 = vadd.f32 %v1359_v8, %v154_v16  ;;  %v212_v42 = vadd.f32 %v1361_v1, %v155_v50  ;;  %v213_v45 = vadd.f32 %v1363_v11, %v156_v6  ;;  %v214_v46 = vadd.f32 %v1365_v13, %v157_v10  ;;  %v257_v16 = vpop.permute.xlu0 %256 }
  0xca   :  { %707 = vmatprep.mubr.f32.mxu0 %v532_v24  ;;  %817 = vmatprep.mubr.f32.mxu1 %v534_v25  ;;  %v218_v61 = vadd.f32 %v1365_v13, %v161_v0  ;;  %v163_v4 = vmul.f32 %v1353_v60, %v90_v48  ;;  %v164_v9 = vmul.f32 %v1355_v62, %v90_v48 }
  0xcb   :  { %v249_v5 = vpop.permute.xlu1 %248  ;;  %708 = vmatmul.mubr.f32.gmra.mrb[10].mxu0 %v531_v26  ;;  %818 = vmatmul.mubr.f32.gmra.mrb[10].mxu1 %v533_v14  ;;  %v165_v18 = vmul.f32 %v1357_v63, %v90_v48  ;;  %v219_v60 = vadd.f32 %v1359_v8, %v162_v7  ;;  %v327_v6 = vmul.f32 %v1377_v28, %v257_v16 }
  0xcc   :  { %v319_v27 = vmul.f32 %v1377_v28, %v249_v5  ;;  %v320_v30 = vmul.f32 %v1379_v29, %v249_v5  ;;  %v321_v31 = vmul.f32 %v1383_v32, %v249_v5  ;;  %v322_v54 = vmul.f32 %v1385_v33, %v249_v5 }
  0xcd   :  { %v220_v62 = vadd.f32 %v1361_v1, %v163_v4  ;;  %v221_v63 = vadd.f32 %v1363_v11, %v164_v9  ;;  %v222_v50 = vadd.f32 %v1365_v13, %v165_v18  ;;  %v328_v10 = vmul.f32 %v1379_v29, %v257_v16 }
  0xce   :  { %v356_v57 = vadd.f32 %v320_v30, %v212_v42  ;;  %v358_v56 = vadd.f32 %v322_v54, %v214_v46  ;;  %v355_v52 = vadd.f32 %v319_v27, %v211_v41  ;;  %v357_v53 = vadd.f32 %v321_v31, %v213_v45 }
  0xcf   :  { %v329_v44 = vmul.f32 %v1383_v32, %v257_v16  ;;  %v330_v5 = vmul.f32 %v1385_v33, %v257_v16  ;;  %v364_v41 = vadd.f32 %v328_v10, %v220_v62 }
  0xd0   :  { %v393_v51 = vpop.permute.xlu1 %392 }
  0xd1   :  { %v463_v2 = vmul.f32 %v1371_v22, %v393_v51  ;;  %v464_v49 = vmul.f32 %v1389_v37, %v393_v51  ;;  %v465_v43 = vmul.f32 %v1373_v23, %v393_v51  ;;  %v466_v35 = vmul.f32 %v1391_v38, %v393_v51 }
  0xd2   :  { %v366_v42 = vadd.f32 %v330_v5, %v222_v50 }
  0xd3   :  { %v500_v47 = vadd.f32 %v464_v49, %v356_v57  ;;  %v502_v58 = vadd.f32 %v466_v35, %v358_v56  ;;  %v499_v34 = vadd.f32 %v463_v2, %v355_v52  ;;  %v501_v39 = vadd.f32 %v465_v43, %v357_v53 }
  0xd5   :  { %v253_v19 = vpop.permute.xlu1 %252  ;;  %v536_v15 = vmax.f32 %v500_v47, 0.0  ;;  %v538_v20 = vmax.f32 %v502_v58, 0.0  ;;  %v535_v21 = vmax.f32 %v499_v34, 0.0  ;;  %v537_v24 = vmax.f32 %v501_v39, 0.0 }
  0xd6   :  { %v323_v25 = vmul.f32 %v1377_v28, %v253_v19  ;;  %v324_v59 = vmul.f32 %v1379_v29, %v253_v19  ;;  %v325_v26 = vmul.f32 %v1383_v32, %v253_v19  ;;  %v326_v14 = vmul.f32 %v1385_v33, %v253_v19 }
  0xd7   :  { %712 = vmatprep.mubr.f32.mxu0 %v536_v15  ;;  %822 = vmatprep.mubr.f32.mxu1 %v538_v20  ;;  %v363_v32 = vadd.f32 %v327_v6, %v219_v60  ;;  %v365_v33 = vadd.f32 %v329_v44, %v221_v63 }
  0xd8   :  { %713 = vmatmul.mubr.f32.gmra.mrb[12].mxu0 %v535_v21  ;;  %823 = vmatmul.mubr.f32.gmra.mrb[12].mxu1 %v537_v24  ;;  %v360_v8 = vadd.f32 %v324_v59, %v216_v55  ;;  %v362_v30 = vadd.f32 %v326_v14, %v218_v61  ;;  %v359_v31 = vadd.f32 %v323_v25, %v215_v40 }
  0xd9   :  { %v361_v54 = vadd.f32 %v325_v26, %v217_v12  ;;  %v1554_v12 = vld [vmem:[%s1584_s4] ss:$0 sm:$0xff]  ;;  %s1228_s4 = smov [#allocation5]  }
  0xda   :  { %v397_v27 = vpop.permute.xlu1 %396  ;;  %s906_s6 = sshll.u32 %s1228_s4, 4  ;;  %s907_s6 = int_to_ptr.vmem [resolvable:$true] %s906_s6 }
  0xdb   :  { %v467_v1 = vmul.f32 %v1371_v22, %v397_v27  ;;  %v468_v11 = vmul.f32 %v1389_v37, %v397_v27  ;;  %v469_v13 = vmul.f32 %v1373_v23, %v397_v27  ;;  %v470_v17 = vmul.f32 %v1391_v38, %v397_v27  ;;  %s1196_s7 = scalar_lea.vmem %s907_s6, 1152  ;;  %p1201_p9 = scmp.lt.s32.totalorder %s907_s6, %s907_s6 }
  0xdc   :  { %p1197_p8 = scmp.ne.s32.totalorder %s907_s6, %s1196_s7  ;;  %p1202_p10 = scmp.lt.s32.totalorder %s1196_s7, %s1196_s7 }
  0xdd   :  { %v504_v28 = vadd.f32 %v468_v11, %v360_v8  ;;  %v506_v36 = vadd.f32 %v470_v17, %v362_v30  ;;  %v503_v29 = vadd.f32 %v467_v1, %v359_v31  ;;  %v505_v3 = vadd.f32 %v469_v13, %v361_v54 }
  0xde   :  { %v401_v45 = vpop.permute.xlu1 %400  ;;  %p1203_p11 = por %p1202_p10, %p1201_p9 }
  0xdf   :  { %v471_v46 = vmul.f32 %v1371_v22, %v401_v45  ;;  %v472_v0 = vmul.f32 %v1389_v37, %v401_v45  ;;  %v473_v51 = vmul.f32 %v1373_v23, %v401_v45  ;;  %v474_v48 = vmul.f32 %v1391_v38, %v401_v45 }
  0xe0   :  { %v540_v57 = vmax.f32 %v504_v28, 0.0  ;;  %v542_v56 = vmax.f32 %v506_v36, 0.0  ;;  %v539_v52 = vmax.f32 %v503_v29, 0.0  ;;  %v541_v53 = vmax.f32 %v505_v3, 0.0  ;;  %p1204_p12 = pnand %p1203_p11, %p1197_p8 }
  0xe1   :  { %v508_v2 = vadd.f32 %v472_v0, %v364_v41  ;;  %v510_v49 = vadd.f32 %v474_v48, %v366_v42  ;;  %v507_v43 = vadd.f32 %v471_v46, %v363_v32  ;;  %v509_v35 = vadd.f32 %v473_v51, %v365_v33 }
  0xe2   :  { %717 = vmatprep.mubr.f32.mxu0 %v540_v57  ;;  %827 = vmatprep.mubr.f32.mxu1 %v542_v56 }
  0xe3   :  { %718 = vmatmul.mubr.f32.gmra.mrb[14].mxu0 %v539_v52  ;;  %828 = vmatmul.mubr.f32.gmra.mrb[14].mxu1 %v541_v53  ;;  %v544_v40 = vmax.f32 %v508_v2, 0.0  ;;  %v546_v22 = vmax.f32 %v510_v49, 0.0  ;;  %v543_v55 = vmax.f32 %v507_v43, 0.0  ;;  %v545_v37 = vmax.f32 %v509_v35, 0.0 }
  0xe5   :  { %722 = vmatprep.mubr.f32.mxu0 %v544_v40  ;;  %832 = vmatprep.mubr.f32.mxu1 %v546_v22 }
  0xe7   :  { %723 = vmatmul.mubr.f32.gmra.mrb[16].mxu0 %v543_v55  ;;  %833 = vmatmul.mubr.f32.gmra.mrb[16].mxu1 %v545_v37 }
 0x17e   :  { %v960_v23 = vpop.f32.mrb[0].mxu0  ;;  %v1019_v38 = vpop.f32.mrb[0].mxu1 }
 0x17f   :  { %v961_v7 = vpop.f32.mrb[1].mxu0  ;;  %v1020_v47 = vpop.f32.mrb[1].mxu1 }
 0x180   :  { %v962_v58 = vadd.f32 %v961_v7, %v960_v23  ;;  %v1021_v34 = vadd.f32 %v1020_v47, %v1019_v38 }
 0x182   :  { %v685_v39 = vadd.f32 %v962_v58, %v1554_v12  ;;  %v963_v61 = vpop.f32.mrb[2].mxu0  ;;  %v1022_v4 = vpop.f32.mrb[2].mxu1 }
 0x183   :  { %v964_v9 = vpop.f32.mrb[3].mxu0  ;;  %v1023_v18 = vpop.f32.mrb[3].mxu1 }
 0x184   :  { %v795_v19 = vadd.f32 %v1021_v34, %v685_v39  ;;  %v965_v15 = vadd.f32 %v964_v9, %v963_v61  ;;  %v1024_v20 = vadd.f32 %v1023_v18, %v1022_v4 }
 0x186   :  { %v919_v21 = vmul.f32 -1.442695, %v795_v19  ;;  %v690_v24 = vadd.f32 %v965_v15, %v1554_v12 }
 0x188   :  { %v966_v25 = vpop.f32.mrb[4].mxu0  ;;  %1138 = vpow2.f32 %v919_v21  ;;  %v800_v26 = vadd.f32 %v1024_v20, %v690_v24 }
 0x189   :  { %v967_v59 = vpop.f32.mrb[5].mxu0  ;;  %v1025_v14 = vpop.f32.mrb[4].mxu1 }
 0x18a   :  { %v968_v16 = vadd.f32 %v967_v59, %v966_v25  ;;  %v1026_v60 = vpop.f32.mrb[5].mxu1  ;;  %v920_v62 = vmul.f32 -1.442695, %v800_v26 }
 0x18b   :  { %v1027_v50 = vadd.f32 %v1026_v60, %v1025_v14 }
 0x18c   :  { %v695_v63 = vadd.f32 %v968_v16, %v1554_v12  ;;  %1140 = vpow2.f32 %v920_v62 }
 0x18e   :  { %v805_v6 = vadd.f32 %v1027_v50, %v695_v63 }
 0x190   :  { %v921_v10 = vmul.f32 -1.442695, %v805_v6 }
 0x192   :  { %1142 = vpow2.f32 %v921_v10  ;;  %v969_v44 = vpop.f32.mrb[6].mxu0  ;;  %v1028_v5 = vpop.f32.mrb[6].mxu1 }
 0x193   :  { %v970_v27 = vpop.f32.mrb[7].mxu0  ;;  %v1139_v8 = vpop.eup %1138 }
 0x194   :  { %v971_v30 = vadd.f32 %v970_v27, %v969_v44  ;;  %v1029_v31 = vpop.f32.mrb[7].mxu1  ;;  %v865_v54 = vadd.f32 1.0, %v1139_v8 }
 0x195   :  { %v1030_v1 = vadd.f32 %v1029_v31, %v1028_v5 }
 0x196   :  { %v700_v11 = vadd.f32 %v971_v30, %v1554_v12  ;;  %v972_v13 = vpop.f32.mrb[8].mxu0  ;;  %1144 = vrcp.f32 %v865_v54  ;;  %v1031_v17 = vpop.f32.mrb[8].mxu1 }
 0x197   :  { %v973_v28 = vpop.f32.mrb[9].mxu0  ;;  %v1141_v36 = vpop.eup %1140 }
 0x198   :  { %v810_v29 = vadd.f32 %v1030_v1, %v700_v11  ;;  %v974_v3 = vadd.f32 %v973_v28, %v972_v13  ;;  %v1032_v32 = vpop.f32.mrb[9].mxu1  ;;  %v866_v41 = vadd.f32 1.0, %v1141_v36 }
 0x199   :  { %v1033_v33 = vadd.f32 %v1032_v32, %v1031_v17 }
 0x19a   :  { %v922_v42 = vmul.f32 -1.442695, %v810_v29  ;;  %v705_v45 = vadd.f32 %v974_v3, %v1554_v12  ;;  %1146 = vrcp.f32 %v866_v41 }
 0x19c   :  { %v1143_v46 = vpop.eup %1142  ;;  %1148 = vpow2.f32 %v922_v42  ;;  %v815_v0 = vadd.f32 %v1033_v33, %v705_v45 }
 0x19d   :  { %v867_v51 = vadd.f32 1.0, %v1143_v46 }
 0x19e   :  { %v923_v48 = vmul.f32 -1.442695, %v815_v0  ;;  %v975_v57 = vpop.f32.mrb[10].mxu0  ;;  %v1034_v56 = vpop.f32.mrb[10].mxu1 }
 0x19f   :  { %1150 = vrcp.f32 %v867_v51  ;;  %v976_v52 = vpop.f32.mrb[11].mxu0  ;;  %v1035_v53 = vpop.f32.mrb[11].mxu1 }
 0x1a0   :  { %1152 = vpow2.f32 %v923_v48  ;;  %v977_v2 = vadd.f32 %v976_v52, %v975_v57  ;;  %v1036_v49 = vadd.f32 %v1035_v53, %v1034_v56  ;;  %v1145_v43 = vpop.eup %1144 }
 0x1a1   :  { %892 = vst [vmem:[#allocation5] sm:$0xff] %v1145_v43 }
 0x1a2   :  { %v710_v35 = vadd.f32 %v977_v2, %v1554_v12 }
 0x1a4   :  { %v820_v40 = vadd.f32 %v1036_v49, %v710_v35  ;;  %v1147_v22 = vpop.eup %1146 }
 0x1a5   :  { %893 = vst [vmem:[#allocation5 + $0x8] sm:$0xff] %v1147_v22 }
 0x1a6   :  { %v1149_v55 = vpop.eup %1148  ;;  %v924_v37 = vmul.f32 -1.442695, %v820_v40 }
 0x1a7   :  { %v868_v23 = vadd.f32 1.0, %v1149_v55 }
 0x1a8   :  { %1154 = vpow2.f32 %v924_v37 }
 0x1a9   :  { %v1151_v38 = vpop.eup %1150  ;;  %1156 = vrcp.f32 %v868_v23 }
 0x1aa   :  { %v1153_v7 = vpop.eup %1152  ;;  %894 = vst [vmem:[#allocation5 + $0x10] sm:$0xff] %v1151_v38 }
 0x1ab   :  { %v869_v47 = vadd.f32 1.0, %v1153_v7  ;;  %v978_v58 = vpop.f32.mrb[12].mxu0  ;;  %v1037_v34 = vpop.f32.mrb[12].mxu1 }
 0x1ac   :  { %v979_v39 = vpop.f32.mrb[13].mxu0  ;;  %v1038_v61 = vpop.f32.mrb[13].mxu1 }
 0x1ad   :  { %1158 = vrcp.f32 %v869_v47  ;;  %v980_v4 = vadd.f32 %v979_v39, %v978_v58  ;;  %v1039_v9 = vadd.f32 %v1038_v61, %v1037_v34 }
 0x1af   :  { %v715_v18 = vadd.f32 %v980_v4, %v1554_v12 }
 0x1b1   :  { %v825_v19 = vadd.f32 %v1039_v9, %v715_v18 }
 0x1b2   :  { %v1155_v15 = vpop.eup %1154 }
 0x1b3   :  { %v1157_v20 = vpop.eup %1156  ;;  %v870_v21 = vadd.f32 1.0, %v1155_v15  ;;  %v925_v24 = vmul.f32 -1.442695, %v825_v19 }
 0x1b4   :  { %895 = vst [vmem:[#allocation5 + $0x18] sm:$0xff] %v1157_v20 }
 0x1b5   :  { %1160 = vrcp.f32 %v870_v21 }
 0x1b6   :  { %1162 = vpow2.f32 %v925_v24  ;;  %v981_v25 = vpop.f32.mrb[14].mxu0  ;;  %v1040_v59 = vpop.f32.mrb[14].mxu1 }
 0x1b7   :  { %v1159_v26 = vpop.eup %1158  ;;  %v982_v14 = vpop.f32.mrb[15].mxu0 }
 0x1b8   :  { %v1041_v16 = vpop.f32.mrb[15].mxu1  ;;  %896 = vst [vmem:[#allocation5 + $0x20] sm:$0xff] %v1159_v26  ;;  %v983_v60 = vadd.f32 %v982_v14, %v981_v25 }
 0x1b9   :  { %v1042_v62 = vadd.f32 %v1041_v16, %v1040_v59 }
 0x1ba   :  { %v720_v63 = vadd.f32 %v983_v60, %v1554_v12  ;;  %v984_v50 = vpop.f32.mrb[16].mxu0  ;;  %v1043_v6 = vpop.f32.mrb[16].mxu1 }
 0x1bb   :  { %v985_v10 = vpop.f32.mrb[17].mxu0  ;;  %v1044_v44 = vpop.f32.mrb[17].mxu1 }
 0x1bc   :  { %v830_v5 = vadd.f32 %v1042_v62, %v720_v63  ;;  %v986_v27 = vadd.f32 %v985_v10, %v984_v50  ;;  %v1045_v8 = vadd.f32 %v1044_v44, %v1043_v6 }
 0x1be   :  { %v926_v30 = vmul.f32 -1.442695, %v830_v5  ;;  %v725_v31 = vadd.f32 %v986_v27, %v1554_v12 }
 0x1bf   :  { %v1161_v54 = vpop.eup %1160 }
 0x1c0   :  { %v1163_v1 = vpop.eup %1162  ;;  %897 = vst [vmem:[#allocation5 + $0x28] sm:$0xff] %v1161_v54  ;;  %1164 = vpow2.f32 %v926_v30  ;;  %v835_v11 = vadd.f32 %v1045_v8, %v725_v31 }
 0x1c1   :  { %v871_v13 = vadd.f32 1.0, %v1163_v1 }
 0x1c2   :  { %v927_v17 = vmul.f32 -1.442695, %v835_v11 }
 0x1c3   :  { %1166 = vrcp.f32 %v871_v13 }
 0x1c4   :  { %1168 = vpow2.f32 %v927_v17 }
 0x1ca   :  { %v1165_v28 = vpop.eup %1164 }
 0x1cb   :  { %v872_v36 = vadd.f32 1.0, %v1165_v28 }
 0x1cd   :  { %v1167_v29 = vpop.eup %1166  ;;  %1170 = vrcp.f32 %v872_v36 }
 0x1ce   :  { %v1169_v3 = vpop.eup %1168  ;;  %898 = vst [vmem:[#allocation5 + $0x30] sm:$0xff] %v1167_v29 }
 0x1cf   :  { %v873_v32 = vadd.f32 1.0, %v1169_v3 }
 0x1d1   :  { %1172 = vrcp.f32 %v873_v32 }
 0x1d7   :  { %v1171_v41 = vpop.eup %1170 }
 0x1d8   :  { %899 = vst [vmem:[#allocation5 + $0x38] sm:$0xff] %v1171_v41 }
 0x1db   :  { %v1173_v12 = vpop.eup %1172 }
 0x1dc   :  { %900 = vst [vmem:[#allocation5 + $0x40] sm:$0xff] %v1173_v12 }
 0x1dd   :  { %1207 = shalt.err (!%p1204_p12)
}
 0x1de   :  { %s1208_s10 = scalar_lea.hbm %s1585_s5, 1152 }
 0x1df   :  { %p1209_p13 = scmp.ne.s32.totalorder %s1585_s5, %s1208_s10  ;;  %p1212_p0 = scmp.lt.u32.totalorder %s1208_s10, %s1585_s5 }
 0x1e1   :  { %p1214_p1 = pnand %p1212_p0, %p1209_p13 }
 0x1e3   :  { %1217 = shalt.err (!%p1214_p1)
}
 0x1e4   :  { %912 = dma.vmem_to_hbm [thread:$0]  %s907_s6, 1152, %s1585_s5, [#allocation4], %s1223_s28, %s1223_s28, %s1224_s29  }
 0x1e5   :  { %1220 = dma.done.wait [#allocation4], 1152  }
 0x1e6   :  { %1221 = vsyncadd [#allocation4], 4294966144 }
 0x1e7   :  { %916 = vsyncpa [#allocation3], 1 }
 0x1e8   :  { %917 = vsyncpa [#allocation4], 1 }

</bundles_post_ra>
